<compile_context>
chip_gen: v6e
topology: v6e:2x2x1
jax: 0.10.0
libtpu: 0.0.40
codegen_flags: <defaults>
</compile_context>

<pallas_src>
import jax
import jax.numpy as jnp
from jax.experimental import pallas as pl
from jax.experimental.pallas import tpu as pltpu

N2 = 20
LAYERS = [2 * N2, 40, 40, 1]   # [40, 40, 40, 1]


# ---------------------------------------------------------------------------
# Kernel: whole 3-layer MLP for one batch tile, in transposed (feature-major)
# layout.  Shapes inside the kernel:
#   x  : (40, TB)      w0t,w1t : (40, 40)   w2t : (1, 40)
#   b0c,b1c : (40, 1)  b2c : (1, 1)         out : (1, TB)
# ---------------------------------------------------------------------------
def _mlp_kernel(xt_ref, w0_ref, b0_ref, w1_ref, b1_ref, w2_ref, b2_ref, o_ref):
    x = xt_ref[...]                                                  # (40, TB)
    h = jnp.tanh(
        jnp.dot(w0_ref[...], x, preferred_element_type=jnp.float32)
        + b0_ref[...]
    )                                                                # (40, TB)
    h = jnp.tanh(
        jnp.dot(w1_ref[...], h, preferred_element_type=jnp.float32)
        + b1_ref[...]
    )                                                                # (40, TB)
    out = (
        jnp.dot(w2_ref[...], h, preferred_element_type=jnp.float32)
        + b2_ref[...]
    )                                                                # (1, TB)
    o_ref[...] = out.astype(o_ref.dtype)


def dnn_forward(x, params, *, tile_b=512):
    """x: (B, 40) float32.  params: dict of w0,b0,w1,b1,w2,b2 (as in PyTorch,
    pre-transposed to [in, out] / [1, out]).  Returns (B, 1) float32."""
    B, Fin = x.shape
    assert Fin == LAYERS[0]
    Fout = LAYERS[-1]

    # Kernel-side layout: weights as [out, in], biases as [out, 1] columns.
    w0t, b0c = params["w0"].T, params["b0"].T
    w1t, b1c = params["w1"].T, params["b1"].T
    w2t, b2c = params["w2"].T, params["b2"].T

    # Lane/MXU-aligned batch tile; shrink for tiny batches so padding stays
    # small, and keep >= 2 grid steps so both v7x TensorCores are used.
    tile_b = max(128, (tile_b // 128) * 128)
    tile_b = min(tile_b, max(128, pl.cdiv(pl.cdiv(B, 2), 128) * 128))
    grid_steps = max(2, pl.cdiv(B, tile_b))
    b_pad = grid_steps * tile_b

    # Batch-on-lanes: (B, 40) -> (40, B_pad), zero-padded (junk columns are
    # computed and sliced away afterwards).
    xt = jnp.pad(x.T.astype(jnp.float32), ((0, 0), (0, b_pad - B)))

    # Constant index_map -> operand is VMEM-resident across the whole grid.
    full = lambda shape: pl.BlockSpec(shape, lambda i: (0, 0))

    out_t = pl.pallas_call(
        _mlp_kernel,
        out_shape=jax.ShapeDtypeStruct((Fout, b_pad), jnp.float32),
        grid_spec=pltpu.PrefetchScalarGridSpec(
            num_scalar_prefetch=0,
            grid=(grid_steps,),
            in_specs=[
                pl.BlockSpec((Fin, tile_b), lambda i: (0, i)),   # x tile
                full(w0t.shape), full(b0c.shape),
                full(w1t.shape), full(b1c.shape),
                full(w2t.shape), full(b2c.shape),
            ],
            out_specs=pl.BlockSpec((Fout, tile_b), lambda i: (0, i)),
        ),
        compiler_params=pltpu.CompilerParams(
            dimension_semantics=("parallel",)
        ),
    )(xt, w0t, b0c, w1t, b1c, w2t, b2c)

    # Back to the PyTorch layout (B, 1).
    return out_t[:, :B].T


# ---------------------------------------------------------------------------
# Deterministic parameter init (mirrors xavier_uniform_ weights and the
# default PyTorch Linear bias init U(-1/sqrt(fan_in), 1/sqrt(fan_in))).
# Stored as [in, out] weights / [1, out] biases.
# ---------------------------------------------------------------------------
def init_params(key, layers=LAYERS):
    params = {}
    keys = jax.random.split(key, 2 * (len(layers) - 1))
    for i in range(len(layers) - 1):
        fan_in, fan_out = layers[i], layers[i + 1]
        gain = 1.0
        bound_w = gain * jnp.sqrt(6.0 / (fan_in + fan_out))
        w = jax.random.uniform(
            keys[2 * i], (fan_in, fan_out), jnp.float32,
            minval=-bound_w, maxval=bound_w,
        )
        bound_b = 1.0 / jnp.sqrt(float(fan_in))
        b = jax.random.uniform(
            keys[2 * i + 1], (1, fan_out), jnp.float32,
            minval=-bound_b, maxval=bound_b,
        )
        params[f"w{i}"] = w
        params[f"b{i}"] = b
    return params


def dnn_reference(x, params):
    h = jnp.tanh(x @ params["w0"] + params["b0"])
    h = jnp.tanh(h @ params["w1"] + params["b1"])
    return h @ params["w2"] + params["b2"]


if __name__ == "__main__":
    key = jax.random.PRNGKey(0)
    k_param, k_x = jax.random.split(key)

    B = 64                                    # small example batch
    x = jax.random.normal(k_x, (B, LAYERS[0]), dtype=jnp.float32)
    params = init_params(k_param)

    out = dnn_forward(x, params)
    out = jax.block_until_ready(out)

    ref = dnn_reference(x, params)
    assert out.shape == (B, 1)
    assert jnp.allclose(out, ref, atol=1e-5, rtol=1e-5), (
        "Pallas kernel output mismatch vs reference"
    )

    print("KERNEL_OK")
</pallas_src>

<mosaic_0001>
module attributes {stable_mosaic.version = 11 : i64} {
  func.func @_mlp_kernel(%arg0: i32, %arg1: memref<40x128xf32, #tpu.memory_space<vmem>>, %arg2: memref<40x40xf32, #tpu.memory_space<vmem>>, %arg3: memref<40x1xf32, #tpu.memory_space<vmem>>, %arg4: memref<40x40xf32, #tpu.memory_space<vmem>>, %arg5: memref<40x1xf32, #tpu.memory_space<vmem>>, %arg6: memref<1x40xf32, #tpu.memory_space<vmem>>, %arg7: memref<1x1xf32, #tpu.memory_space<vmem>>, %arg8: memref<1x128xf32, #tpu.memory_space<vmem>>) attributes {dimension_semantics = [#tpu.dimension_semantics<parallel>], iteration_bounds = array<i64: 2>, scalar_prefetch = 0 : i64, scratch_operands = 0 : i64, tpu.core_type = #tpu.core_type<tc>, window_params = [{transform_indices = @transform_0, window_bounds = array<i64: 40, 128>}, {pipeline_mode = #tpu.pipeline_mode<synchronous>, transform_indices = @transform_1, window_bounds = array<i64: 40, 40>}, {pipeline_mode = #tpu.pipeline_mode<synchronous>, transform_indices = @transform_2, window_bounds = array<i64: 40, 1>}, {pipeline_mode = #tpu.pipeline_mode<synchronous>, transform_indices = @transform_3, window_bounds = array<i64: 40, 40>}, {pipeline_mode = #tpu.pipeline_mode<synchronous>, transform_indices = @transform_4, window_bounds = array<i64: 40, 1>}, {pipeline_mode = #tpu.pipeline_mode<synchronous>, transform_indices = @transform_5, window_bounds = array<i64: 1, 40>}, {pipeline_mode = #tpu.pipeline_mode<synchronous>, transform_indices = @transform_6, window_bounds = array<i64: 1, 1>}, {transform_indices = @transform_7, window_bounds = array<i64: 1, 128>}]} {
    %c0 = arith.constant 0 : index
    %c0_0 = arith.constant 0 : index
    %0 = vector.load %arg1[%c0, %c0_0] : memref<40x128xf32, #tpu.memory_space<vmem>>, vector<40x128xf32>
    %c0_1 = arith.constant 0 : index
    %c0_2 = arith.constant 0 : index
    %1 = vector.load %arg2[%c0_1, %c0_2] : memref<40x40xf32, #tpu.memory_space<vmem>>, vector<40x40xf32>
    %cst = arith.constant dense<0.000000e+00> : vector<40x128xf32>
    %2 = tpu.matmul %1, %0, %cst {dimension_numbers = #tpu.dot_dimension_numbers<[1], [0], [0], [1], [0, 0, 1, 1], [], []>} : vector<40x40xf32>, vector<40x128xf32>, vector<40x128xf32> -> vector<40x128xf32>
    %c0_3 = arith.constant 0 : index
    %c0_4 = arith.constant 0 : index
    %3 = vector.load %arg3[%c0_3, %c0_4] : memref<40x1xf32, #tpu.memory_space<vmem>>, vector<40x1xf32>
    %4 = vector.broadcast %3 : vector<40x1xf32> to vector<40x128xf32>
    %5 = arith.addf %2, %4 : vector<40x128xf32>
    %6 = math.tanh %5 : vector<40x128xf32>
    %c0_5 = arith.constant 0 : index
    %c0_6 = arith.constant 0 : index
    %7 = vector.load %arg4[%c0_5, %c0_6] : memref<40x40xf32, #tpu.memory_space<vmem>>, vector<40x40xf32>
    %cst_7 = arith.constant dense<0.000000e+00> : vector<40x128xf32>
    %8 = tpu.matmul %7, %6, %cst_7 {dimension_numbers = #tpu.dot_dimension_numbers<[1], [0], [0], [1], [0, 0, 1, 1], [], []>} : vector<40x40xf32>, vector<40x128xf32>, vector<40x128xf32> -> vector<40x128xf32>
    %c0_8 = arith.constant 0 : index
    %c0_9 = arith.constant 0 : index
    %9 = vector.load %arg5[%c0_8, %c0_9] : memref<40x1xf32, #tpu.memory_space<vmem>>, vector<40x1xf32>
    %10 = vector.broadcast %9 : vector<40x1xf32> to vector<40x128xf32>
    %11 = arith.addf %8, %10 : vector<40x128xf32>
    %12 = math.tanh %11 : vector<40x128xf32>
    %c0_10 = arith.constant 0 : index
    %c0_11 = arith.constant 0 : index
    %13 = vector.load %arg6[%c0_10, %c0_11] : memref<1x40xf32, #tpu.memory_space<vmem>>, vector<1x40xf32>
    %cst_12 = arith.constant dense<0.000000e+00> : vector<1x128xf32>
    %14 = tpu.matmul %13, %12, %cst_12 {dimension_numbers = #tpu.dot_dimension_numbers<[1], [0], [0], [1], [0, 0, 1, 1], [], []>} : vector<1x40xf32>, vector<40x128xf32>, vector<1x128xf32> -> vector<1x128xf32>
    %c0_13 = arith.constant 0 : index
    %c0_14 = arith.constant 0 : index
    %15 = vector.load %arg7[%c0_13, %c0_14] : memref<1x1xf32, #tpu.memory_space<vmem>>, vector<1x1xf32>
    %16 = vector.broadcast %15 : vector<1x1xf32> to vector<1x128xf32>
    %17 = arith.addf %14, %16 : vector<1x128xf32>
    %c0_15 = arith.constant 0 : index
    %c0_16 = arith.constant 0 : index
    %18 = vector.load %arg8[%c0_15, %c0_16] : memref<1x128xf32, #tpu.memory_space<vmem>>, vector<1x128xf32>
    tpu.vector_store %arg8[%c0_15, %c0_16], %17 {strides = array<i32>} : memref<1x128xf32, #tpu.memory_space<vmem>>, vector<1x128xf32>,
    return
  }
  func.func @transform_0(%arg0: i32) -> (i32, i32) {
    %c0_i32 = arith.constant 0 : i32
    %c0_i32_0 = arith.constant 0 : i32
    return %c0_i32, %arg0 : i32, i32
  }
  func.func @transform_1(%arg0: i32) -> (i32, i32) {
    %c0_i32 = arith.constant 0 : i32
    %c0_i32_0 = arith.constant 0 : i32
    %c0_i32_1 = arith.constant 0 : i32
    return %c0_i32, %c0_i32_0 : i32, i32
  }
  func.func @transform_2(%arg0: i32) -> (i32, i32) {
    %c0_i32 = arith.constant 0 : i32
    %c0_i32_0 = arith.constant 0 : i32
    %c0_i32_1 = arith.constant 0 : i32
    return %c0_i32, %c0_i32_0 : i32, i32
  }
  func.func @transform_3(%arg0: i32) -> (i32, i32) {
    %c0_i32 = arith.constant 0 : i32
    %c0_i32_0 = arith.constant 0 : i32
    %c0_i32_1 = arith.constant 0 : i32
    return %c0_i32, %c0_i32_0 : i32, i32
  }
  func.func @transform_4(%arg0: i32) -> (i32, i32) {
    %c0_i32 = arith.constant 0 : i32
    %c0_i32_0 = arith.constant 0 : i32
    %c0_i32_1 = arith.constant 0 : i32
    return %c0_i32, %c0_i32_0 : i32, i32
  }
  func.func @transform_5(%arg0: i32) -> (i32, i32) {
    %c0_i32 = arith.constant 0 : i32
    %c0_i32_0 = arith.constant 0 : i32
    %c0_i32_1 = arith.constant 0 : i32
    return %c0_i32, %c0_i32_0 : i32, i32
  }
  func.func @transform_6(%arg0: i32) -> (i32, i32) {
    %c0_i32 = arith.constant 0 : i32
    %c0_i32_0 = arith.constant 0 : i32
    %c0_i32_1 = arith.constant 0 : i32
    return %c0_i32, %c0_i32_0 : i32, i32
  }
  func.func @transform_7(%arg0: i32) -> (i32, i32) {
    %c0_i32 = arith.constant 0 : i32
    %c0_i32_0 = arith.constant 0 : i32
    return %c0_i32, %arg0 : i32, i32
  }
}

</mosaic_0001>

<bundles_post_ra>
// kernel: tpu_custom_call.1
= control target key start
LH: loop header
LB: loop body
LE: loop exit
PB: predicated region body
PF: predicated region fallthrough
CT: control target
= control target key end

     0   :  { %s1441_s0 = inlined_call_operand.vmem [shape: f32[40,256], index: 0, kind: input, shape index: {}]   ;;  %s1442_s1 = inlined_call_operand.hbm [shape: f32[40,40], index: 1, kind: input, shape index: {}]   ;;  %s1443_s2 = inlined_call_operand.vmem [shape: f32[40,1], index: 2, kind: input, shape index: {}]   ;;  %s1444_s3 = inlined_call_operand.hbm [shape: f32[40,40], index: 3, kind: input, shape index: {}]   ;;  %s1445_s4 = inlined_call_operand.vmem [shape: f32[40,1], index: 4, kind: input, shape index: {}]   ;;  %s1446_s5 = inlined_call_operand.vmem [shape: f32[1,40], index: 5, kind: input, shape index: {}]   ;;  %s1447_s6 = inlined_call_operand.<no memory space> [shape: f32[1,1], index: 6, kind: input, shape index: {}]   ;;  %s1448_s7 = inlined_call_operand.hbm [shape: f32[1,256], index: 7, kind: output, shape index: {}]  }
   0x1   :  { %v12_v0 = vstv %s1447_s6 }
   0x2   :  { %13 = vst [vmem:[#allocation2] sm:$0x1] %v12_v0 }
   0x3   :  { %14 = vsyncpa [#allocation5], 0 }
   0x4   :  { %15 = vsyncpa [#allocation8], 0 }
   0x5   :  { %16 = vsyncpa [#allocation6], 0 }
   0x6   :  { %18 = vsyncpa [#allocation6 + $0x1], 0  ;;  %s1210_s26 = smov 0   ;;  %s1212_s27 = smov 0  }
   0x7   :  { %s1214_s28 = smov 0   ;;  %s1216_s29 = smov 0  }
   0x8 LB: > { %s1231_s6 = sadd.s32 4294967295, %s1157_s29   ;;  %s836_s30 = sadd.s32 4294967294, %s1157_s29   ;;  %s1157_s29 = sphi %s1216_s29, %s1465_s29   ;;  %s1153_s28 = sphi %s1214_s28, %s1464_s28   ;;  %s1149_s27 = sphi %s1212_s27, %s1463_s27   ;;  %s1145_s26 = sphi %s1210_s26, %s1462_s26  }
   0x9   : > { %s1235_s8 = sadd.s32 1, %s1157_s29   ;;  %s31_s9 = sadd.s32 1, %s1153_s28 }
   0xa   : > { %s28_s10 = ssub.s32 %s1157_s29, %s1235_s8  ;;  %p38_p0 = scmp.ne.s32.totalorder %s1153_s28, %s1149_s27 }
   0xb   : > { %p29_p1 = scmp.eq.s32.totalorder %s28_s10, 0  ;;  %p39_p2 = scmp.eq.s32.totalorder %s1157_s29, 0 }
   0xc   : > { %p194_p3 = scmp.eq.s32.totalorder %s1231_s6, 1  ;;  %p199_p4 = scmp.ne.s32.totalorder %s1149_s27, %s1145_s26 }
   0xd   : > { %s1247_s11 = scalar_select %p29_p1, %s1153_s28, %s31_s9  }
   0xe   : > { %p1249_p5 = por %p39_p2, %p38_p0  ;;  %p1253_p6 = por %p194_p3, %p38_p0 }
   0xf   : > { %p200_p7 = scmp.eq.s32.totalorder %s836_s30, 1  ;;  %p837_p8 = scmp.ge.s32.totalorder %s1157_s29, 1 }
  0x10   : > { %s1452_s13 = scalar_select %p1253_p6, 1, 0 }
  0x11   : > { %p207_p9 = scmp.lt.s32.totalorder %s1157_s29, 3  ;;  %p1259_p10 = por %p200_p7, %p199_p4 }
  0x12   : > { %p1449_p11 = scmp.eq.s32.totalorder %s1231_s6, 0  ;;  %s1159_s16 = smov [#allocation4]  }
  0x13   : > { %s1453_s14 = scalar_select %p1259_p10, 1, 0 }
  0x14   : > { %p1264_p12 = pnand %p837_p8, %p207_p9  ;;  %s219_s17 = sshll.u32 %s1159_s16, 4  ;;  %s220_s17 = int_to_ptr.vmem [resolvable:$true] %s219_s17 }
  0x15   : > { %s1160_s19 = smov [#allocation7]   ;;  %s1048_s21 = scalar_lea.vmem %s220_s17, 640 }
  0x16   : > { %p960_p13 = pneg %p1264_p12  ;;  %s235_s20 = sshll.u32 %s1160_s19, 4  ;;  %s236_s20 = int_to_ptr.vmem [resolvable:$true] %s235_s20 }
  0x17   : > { %p1049_p2 = scmp.ne.s32.totalorder %s220_s17, %s1048_s21  ;;  %p1056_p7 = scmp.lt.s32.totalorder %s220_s17, %s220_s17 }
  0x18   : > { %p1272_p0 = pnand %p1449_p11, %p960_p13  ;;  %p1057_p8 = scmp.lt.s32.totalorder %s1048_s21, %s1048_s21 }
  0x1a   : > { %p1039_p1 = pneg %p1272_p0  ;;  %p1058_p9 = por %p1057_p8, %p1056_p7 }
  0x1c   : > { %p1051_p3 = pnand %p1049_p2, %p1039_p1 }
  0x1e   : > { %p1052_p4 = pneg %p1051_p3 }
  0x20   : > { %p1059_p13 = pnand %p1058_p9, %p1052_p4 }
  0x22   : > { %1062 = shalt.err (!%p1059_p13)
}
  0x23   : > { %s1161_s22 = smov 128   ;;  %s1162_s23 = smov 8  }
  0x24   : > { %963 = dma.hbm_to_vmem [thread:$0]  (!%p1272_p0), %s1442_s1, 640, %s220_s17, [#allocation5], %s1161_s22, %s1161_s22, %s1162_s23  }
  0x25   : > { %s1074_s30 = scalar_lea.vmem %s236_s20, 640  ;;  %p1082_p10 = scmp.lt.s32.totalorder %s236_s20, %s236_s20 }
  0x26   : > { %p1075_p11 = scmp.ne.s32.totalorder %s236_s20, %s1074_s30  ;;  %p1083_p6 = scmp.lt.s32.totalorder %s1074_s30, %s1074_s30 }
  0x28   : > { %p1077_p2 = pnand %p1075_p11, %p1039_p1  ;;  %p1084_p7 = por %p1083_p6, %p1082_p10 }
  0x2a   : > { %p1078_p3 = pneg %p1077_p2 }
  0x2c   : > { %p1085_p4 = pnand %p1084_p7, %p1078_p3 }
  0x2e   : > { %1088 = shalt.err (!%p1085_p4)
}
  0x2f   : > { %966 = dma.hbm_to_vmem [thread:$0]  (!%p1272_p0), %s1444_s3, 640, %s236_s20, [#allocation8], %s1161_s22, %s1161_s22, %s1162_s23  }
  0x30   : > { %p840_p8 = scmp.ge.s32.totalorder %s1157_s29, 2 }
  0x32   : > { %254 = sbr.rel (%p840_p8) target bundleno = 62 (0x3e), region = 40 }
  0x37   : > { %257 = sbr.rel (!%p1249_p5) target bundleno = 62 (0x3e), region = 44  ;;  %s259_s16 = sand.u32 (%p1249_p5), 1, %s1153_s28  }
  0x38   : > { %s841_s17 = sshll.u32 (%p1249_p5), %s1157_s29, 3  ;;  %s948_s19 = smul.u32 (%p1249_p5), 40, %s259_s16 }
  0x39   : > { %s263_s18 = scalar_lea.vmem (%p1249_p5), %s1441_s0, %s841_s17 }
  0x3a   : > { %v300_v1 = vld [vmem:[%s263_s18] sm:$0xff] (%p1249_p5)  ;;  %v302_v2 = vld [vmem:[%s263_s18 + $0x10] sm:$0xff] (%p1249_p5)  ;;  %s261_s20 = scalar_lea.vmem (%p1249_p5), [#allocation3], %s948_s19 }
  0x3b   : > { %v304_v3 = vld [vmem:[%s263_s18 + $0x20] sm:$0xff] (%p1249_p5)  ;;  %v306_v4 = vld [vmem:[%s263_s18 + $0x30] sm:$0xff] (%p1249_p5)  ;;  %301 = vst [vmem:[%s261_s20] sm:$0xff] (%p1249_p5), %v300_v1  ;;  %303 = vst [vmem:[%s261_s20 + $0x8] sm:$0xff] (%p1249_p5), %v302_v2 }
  0x3c   : > { %v308_v5 = vld [vmem:[%s263_s18 + $0x40] sm:$0xff]  ;;  %305 = vst [vmem:[%s261_s20 + $0x10] sm:$0xff] %v304_v3  ;;  %307 = vst [vmem:[%s261_s20 + $0x18] sm:$0xff] %v306_v4 }
  0x3d   : > { %309 = vst [vmem:[%s261_s20 + $0x20] sm:$0xff] %v308_v5 }
  0x3e PF: > { %318 = sbr.rel (%p1264_p12) target bundleno = 760 (0x2f8), region = 82  ;;  %s1307_s12 = sand.u32 (!%p1264_p12), 1, %s1149_s27  }
  0x3f   : > { %s949_s22 = smul.u32 (!%p1264_p12), 40, %s1307_s12  ;;  %p1456_p5 = scmp.eq.s32.totalorder (!%p1264_p12), %s1231_s6, 0 }
  0x41   : > { %s323_s23 = scalar_lea.vmem (!%p1264_p12), [#allocation3], %s949_s22 }
  0x43   : > { %1132 = dma.done.wait (%p1456_p5), [#allocation5], 640   ;;  %p1457_p6 = pmov %p1456_p5 }
  0x44   : > { %p1458_p10 = pmov %p1456_p5 }
  0x45   : > { %1134 = vsyncadd (%p1457_p6), [#allocation5], 4294966656 }
  0x46   : > { %1136 = dma.done.wait (%p1458_p10), [#allocation8], 640   ;;  %p1459_p11 = pmov %p1456_p5 }
  0x47   : > { %v1163_v6 = vmov 0.0   ;;  %vm1164_vm0 = vmmov 0   ;;  %v1165_v7 = vmov 0   ;;  %v363_v8 = vld [vmem:[%s323_s23 + $0x20] sm:$0xff]  ;;  %v362_v9 = vld [vmem:[%s323_s23 + $0x18] sm:$0xff]  ;;  %v361_v10 = vld [vmem:[%s323_s23 + $0x10] sm:$0xff] }
  0x48   : > { %1138 = vsyncadd (%p1459_p11), [#allocation8], 4294966656  ;;  %885 = vmatprep.subr.mxu0 %v1163_v6  ;;  %895 = vmatprep.mubr.msk.f32.mxu0 %vm1164_vm0, %v1163_v6  ;;  %v373_v11 = vld [vmem:[%s1443_s2 + $0x20] sm:$0xff]  ;;  %v360_v12 = vld [vmem:[%s323_s23 + $0x8] sm:$0xff]  ;;  %vm399_vm1 = vcmask 326656   ;;  %s856_s21 = sshll.u32 %s1231_s6, 4 }
  0x49   : > { %1015 = vset.pattern.permute.xlu0 %v1165_v7  ;;  %1016 = vset.pattern.permute.xlu1 %v1165_v7  ;;  %v371_v13 = vld [vmem:[%s1443_s2 + $0x10] sm:$0xff]  ;;  %v372_v14 = vld [vmem:[%s1443_s2 + $0x18] sm:$0xff]  ;;  %v370_v16 = vld [vmem:[%s1443_s2 + $0x8] sm:$0xff]  ;;  %s358_s24 = scalar_lea.vmem [#allocation9], %s1307_s12  ;;  %s741_s15 = scalar_lea.sflag [#allocation6], %s1307_s12 }
  0x4a   : > { %910 = vmatprep.subr.mxu1 %v1163_v6  ;;  %920 = vmatprep.mubr.msk.f32.mxu1 %vm1164_vm0, %v1163_v6  ;;  %v359_v15 = vld [vmem:[%s323_s23] sm:$0xff]  ;;  %v364_v17 = vld [vmem:[#allocation4] sm:$0xff]  ;;  %v365_v20 = vld [vmem:[#allocation4 + $0x8] sm:$0xff]  ;;  %s753_s18 = sshll.u32 %s358_s24, 4  ;;  %s1404_s23 = scalar_lea.hbm %s1448_s7, %s856_s21  ;;  %s754_s18 = int_to_ptr.vmem [resolvable:$true] %s753_s18 }
  0x4b   : > { %886 = vmatpush3.msra.mxu0 %v363_v8  ;;  %396 = vperm.xlu0 %1015, %v373_v11   ;;  %v369_v18 = vld [vmem:[%s1443_s2] sm:$0xff]  ;;  %v518_v21 = vld [vmem:[%s1445_s4 + $0x18] sm:$0xff]  ;;  %v517_v22 = vld [vmem:[%s1445_s4 + $0x10] sm:$0xff]  ;;  %s1089_s25 = scalar_lea.vmem %s754_s18, 16  ;;  %p1460_p0 = scmp.ne.s32.totalorder %s1452_s13, 0 }
  0x4c   : > { %887 = vmatprep.subr.mxu0 %v1163_v6  ;;  %386 = vperm.xlu1 %1016, %v371_v13   ;;  %v519_v19 = vld [vmem:[%s1445_s4 + $0x20] sm:$0xff]  ;;  %v516_v24 = vld [vmem:[%s1445_s4 + $0x8] sm:$0xff]  ;;  %v368_v28 = vld [vmem:[#allocation4 + $0x20] sm:$0xff]  ;;  %p1090_p12 = scmp.ne.s32.totalorder %s754_s18, %s1089_s25  ;;  %s1166_s6 = smov [#allocation9]  }
  0x4d   : > { %888 = vmatpush3.msra.mxu0 %v362_v9  ;;  %v366_v23 = vld [vmem:[#allocation4 + $0x10] sm:$0xff]  ;;  %v367_v26 = vld [vmem:[#allocation4 + $0x18] sm:$0xff]  ;;  %v656_v27 = vld [vmem:[#allocation2] sm:$0x1]  ;;  %s1093_s30 = sshll.u32 %s1166_s6, 4  ;;  %s1094_s30 = int_to_ptr.vmem [resolvable:$false] %s1093_s30 }
  0x4e   : > { %889 = vmatprep.subr.mxu0 %v1163_v6  ;;  %v515_v25 = vld [vmem:[%s1445_s4] sm:$0xff]  ;;  %v512_v56 = vld [vmem:[#allocation7 + $0x10] sm:$0xff]  ;;  %v513_v57 = vld [vmem:[#allocation7 + $0x18] sm:$0xff]  ;;  %p1091_p1 = pnand %p1090_p12, %p1460_p0  ;;  %s1095_s9 = scalar_lea.vmem %s1094_s30, 32 }
  0x4f   : > { %890 = vmatpush3.msra.mxu0 %v361_v10  ;;  %391 = vperm.xlu0 %1015, %v372_v14   ;;  %v510_v53 = vld [vmem:[#allocation7] sm:$0xff]  ;;  %v511_v55 = vld [vmem:[#allocation7 + $0x8] sm:$0xff]  ;;  %p1096_p13 = scmp.lt.s32.totalorder %s754_s18, %s1094_s30  ;;  %p1097_p2 = scmp.lt.s32.totalorder %s1095_s9, %s1089_s25 }
  0x50   : > { %891 = vmatprep.subr.mxu0 %v1163_v6  ;;  %381 = vperm.xlu1 %1016, %v370_v16   ;;  %v514_v58 = vld [vmem:[#allocation7 + $0x20] sm:$0xff]  ;;  %p1092_p9 = pneg %p1091_p1 }
  0x51   : > { %892 = vmatpush3.msra.mxu0 %v360_v12  ;;  %p1098_p3 = por %p1097_p2, %p1096_p13 }
  0x52   : > { %893 = vmatprep.subr.mxu0 %v1163_v6 }
  0x53   : > { %894 = vmatpush3.msra.mxu0 %v359_v15  ;;  %376 = vperm.xlu0 %1015, %v369_v18   ;;  %p1099_p7 = pnand %p1098_p3, %p1092_p9 }
  0x54   : > { %896 = vmatmul.mubr.msk.f32.vlgmr.msra.gmra.mxu0 %vm399_vm1, %v364_v17  ;;  %935 = vmatprep.subr.mxu0 %v1163_v6 }
  0x55   : > { %898 = vmatprep.mubr.msk.f32.mxu0 %vm1164_vm0, %v1163_v6  ;;  %542 = vperm.xlu1 %1016, %v519_v19  }
  0x57   : > { %537 = vperm.xlu0 %1015, %v518_v21  }
  0x58   : > { %899 = vmatmul.mubr.msk.f32.gmra.mxu0 %vm399_vm1, %v365_v20  ;;  %v655_v20 = vld [vmem:[%s1446_s5] sm:$0x1] }
  0x59   : > { %901 = vmatprep.mubr.msk.f32.mxu0 %vm1164_vm0, %v1163_v6  ;;  %532 = vperm.xlu1 %1016, %v517_v22   ;;  %v662_v22 = vlaneseq }
  0x5b   : > { %527 = vperm.xlu0 %1015, %v516_v24  }
  0x5c   : > { %902 = vmatmul.mubr.msk.f32.gmra.mxu0 %vm399_vm1, %v366_v23  ;;  %v663_v23 = vshrl.u32 %v662_v22, 7 }
  0x5d   : > { %904 = vmatprep.mubr.msk.f32.mxu0 %vm1164_vm0, %v1163_v6  ;;  %522 = vperm.xlu1 %1016, %v515_v25  }
  0x5e   : > { %v664_v24 = vsub.s32 0, %v663_v23 }
  0x5f   : > { %659 = vperm.xlu0 %1015, %v656_v27  }
  0x60   : > { %905 = vmatmul.mubr.msk.f32.gmra.mxu0 %vm399_vm1, %v367_v26 }
  0x61   : > { %907 = vmatprep.mubr.msk.f32.mxu0 %vm1164_vm0, %v1163_v6 }
  0x64   : > { %908 = vmatmul.mubr.msk.f32.gmra.mxu0 %vm399_vm1, %v368_v28 }
  0x65   : > { %945 = vmatprep.mubr.msk.f32.mxu0 %vm1164_vm0, %v1163_v6 }
  0xc6   : > { %v397_v33 = vpop.permute.xlu0 %396 }
  0xc7   : > { %v387_v36 = vpop.permute.xlu1 %386 }
  0xca   : > { %v392_v38 = vpop.permute.xlu0 %391 }
  0xcb   : > { %v382_v43 = vpop.permute.xlu1 %381 }
  0xce   : > { %v377_v46 = vpop.permute.xlu0 %376 }
  0xd0   : > { %v543_v0 = vpop.permute.xlu1 %542 }
  0xd2   : > { %v538_v3 = vpop.permute.xlu0 %537 }
  0xd4   : > { %v533_v5 = vpop.permute.xlu1 %532 }
  0xd6   : > { %v528_v12 = vpop.permute.xlu0 %527 }
  0xd8   : > { %v523_v14 = vpop.permute.xlu1 %522 }
  0xda   : > { %v660_v25 = vpop.permute.xlu0 %659 }
  0xdb   : > { %v665_v26 = vrot.slane %v660_v25, %v664_v24 }
 0x114   : > { %v481_v29 = vpop.f32.mrf.mxu0 }
 0x115   : > { %v482_v48 = vadd.f32 %v481_v29, %v377_v46 }
 0x116   : > { %v897_v30 = vpop.f32.mrf.mxu0 }
 0x118   : > { %v486_v31 = vpop.f32.mrf.mxu0 }
 0x119   : > { %v487_v47 = vadd.f32 %v486_v31, %v382_v43 }
 0x11a   : > { %v900_v32 = vpop.f32.mrf.mxu0 }
 0x11c   : > { %v491_v34 = vpop.f32.mrf.mxu0 }
 0x11d   : > { %v492_v45 = vadd.f32 %v491_v34, %v387_v36 }
 0x11e   : > { %v903_v35 = vpop.f32.mrf.mxu0 }
 0x120   : > { %v496_v37 = vpop.f32.mrf.mxu0 }
 0x121   : > { %v497_v41 = vadd.f32 %v496_v37, %v392_v38 }
 0x122   : > { %v906_v39 = vpop.f32.mrf.mxu0 }
 0x124   : > { %v501_v40 = vpop.f32.mrf.mxu0 }
 0x125   : > { %v502_v42 = vadd.f32 %v501_v40, %v397_v33 }
 0x126   : > { %v909_v44 = vpop.f32.mrf.mxu0 }
 0x127   : > { %1017 = vtanh.f32 %v502_v42 }
 0x128   : > { %1019 = vtanh.f32 %v497_v41 }
 0x129   : > { %1021 = vtanh.f32 %v492_v45 }
 0x12a   : > { %1023 = vtanh.f32 %v487_v47 }
 0x12b   : > { %1025 = vtanh.f32 %v482_v48 }
 0x134   : > { %v1018_v49 = vpop.eup %1017 }
 0x135   : > { %911 = vmatpush3.msra.mxu1 %v1018_v49  ;;  %v1020_v50 = vpop.eup %1019 }
 0x136   : > { %912 = vmatprep.subr.mxu1 %v1163_v6  ;;  %v1022_v51 = vpop.eup %1021 }
 0x137   : > { %913 = vmatpush3.msra.mxu1 %v1020_v50  ;;  %v1024_v52 = vpop.eup %1023 }
 0x138   : > { %914 = vmatprep.subr.mxu1 %v1163_v6  ;;  %v1026_v54 = vpop.eup %1025 }
 0x139   : > { %915 = vmatpush3.msra.mxu1 %v1022_v51 }
 0x13a   : > { %916 = vmatprep.subr.mxu1 %v1163_v6 }
 0x13b   : > { %917 = vmatpush3.msra.mxu1 %v1024_v52 }
 0x13c   : > { %918 = vmatprep.subr.mxu1 %v1163_v6 }
 0x13d   : > { %919 = vmatpush3.msra.mxu1 %v1026_v54 }
 0x13e   : > { %921 = vmatmul.mubr.msk.f32.vlgmr.msra.gmra.mxu1 %vm399_vm1, %v510_v53 }
 0x13f   : > { %923 = vmatprep.mubr.msk.f32.mxu1 %vm1164_vm0, %v1163_v6 }
 0x142   : > { %924 = vmatmul.mubr.msk.f32.gmra.mxu1 %vm399_vm1, %v511_v55 }
 0x143   : > { %926 = vmatprep.mubr.msk.f32.mxu1 %vm1164_vm0, %v1163_v6 }
 0x146   : > { %927 = vmatmul.mubr.msk.f32.gmra.mxu1 %vm399_vm1, %v512_v56 }
 0x147   : > { %929 = vmatprep.mubr.msk.f32.mxu1 %vm1164_vm0, %v1163_v6 }
 0x14a   : > { %930 = vmatmul.mubr.msk.f32.gmra.mxu1 %vm399_vm1, %v513_v57 }
 0x14b   : > { %932 = vmatprep.mubr.msk.f32.mxu1 %vm1164_vm0, %v1163_v6 }
 0x14e   : > { %933 = vmatmul.mubr.msk.f32.gmra.mxu1 %vm399_vm1, %v514_v58 }
 0x1fe   : > { %v626_v59 = vpop.f32.mrf.mxu1 }
 0x1ff   : > { %v627_v15 = vadd.f32 %v626_v59, %v523_v14 }
 0x200   : > { %v922_v60 = vpop.f32.mrf.mxu1 }
 0x202   : > { %v631_v61 = vpop.f32.mrf.mxu1 }
 0x203   : > { %v632_v13 = vadd.f32 %v631_v61, %v528_v12 }
 0x204   : > { %v925_v62 = vpop.f32.mrf.mxu1 }
 0x206   : > { %v636_v63 = vpop.f32.mrf.mxu1 }
 0x207   : > { %v637_v11 = vadd.f32 %v636_v63, %v533_v5 }
 0x208   : > { %v928_v1 = vpop.f32.mrf.mxu1 }
 0x20a   : > { %v641_v2 = vpop.f32.mrf.mxu1 }
 0x20b   : > { %v642_v8 = vadd.f32 %v641_v2, %v538_v3 }
 0x20c   : > { %v931_v4 = vpop.f32.mrf.mxu1 }
 0x20e   : > { %v646_v7 = vpop.f32.mrf.mxu1 }
 0x20f   : > { %v647_v9 = vadd.f32 %v646_v7, %v543_v0 }
 0x210   : > { %v934_v10 = vpop.f32.mrf.mxu1 }
 0x211   : > { %1027 = vtanh.f32 %v647_v9 }
 0x212   : > { %1029 = vtanh.f32 %v642_v8 }
 0x213   : > { %1031 = vtanh.f32 %v637_v11 }
 0x214   : > { %1033 = vtanh.f32 %v632_v13 }
 0x215   : > { %1035 = vtanh.f32 %v627_v15 }
 0x21e   : > { %v1028_v16 = vpop.eup %1027 }
 0x21f   : > { %936 = vmatpush3.msra.mxu0 %v1028_v16  ;;  %v1030_v17 = vpop.eup %1029 }
 0x220   : > { %937 = vmatprep.subr.mxu0 %v1163_v6  ;;  %v1032_v18 = vpop.eup %1031 }
 0x221   : > { %938 = vmatpush3.msra.mxu0 %v1030_v17  ;;  %v1034_v19 = vpop.eup %1033 }
 0x222   : > { %939 = vmatprep.subr.mxu0 %v1163_v6  ;;  %v1036_v21 = vpop.eup %1035 }
 0x223   : > { %940 = vmatpush3.msra.mxu0 %v1032_v18 }
 0x224   : > { %941 = vmatprep.subr.mxu0 %v1163_v6 }
 0x225   : > { %942 = vmatpush3.msra.mxu0 %v1034_v19 }
 0x226   : > { %943 = vmatprep.subr.mxu0 %v1163_v6 }
 0x227   : > { %944 = vmatpush3.msra.mxu0 %v1036_v21 }
 0x228   : > { %946 = vmatmul.mubr.msk.f32.vlgmr.msra.gmra.mxu0 %vm399_vm1, %v655_v20 }
 0x2e8   : > { %v735_v27 = vpop.f32.mrf.mxu0 }
 0x2e9   : > { %v736_v28 = vadd.f32 %v735_v27, %v665_v26 }
 0x2ea   : > { %v947_v6 = vpop.f32.mrf.mxu0 }
 0x2eb   : > { %739 = vst [vmem:[%s358_s24] sm:$0x1] %v736_v28 }
 0x2ec   : > { %1102 = shalt.err (!%p1099_p7)
}
 0x2ed   : > { %s1103_s10 = scalar_lea.hbm %s1404_s23, 16  ;;  %s1107_s17 = scalar_lea.hbm %s1448_s7, 32 }
 0x2ee   : > { %p1104_p4 = scmp.ne.s32.totalorder %s1404_s23, %s1103_s10  ;;  %p1108_p10 = scmp.lt.s32.totalorder %s1404_s23, %s1448_s7 }
 0x2ef   : > { %p1109_p11 = scmp.lt.s32.totalorder %s1107_s17, %s1103_s10 }
 0x2f0   : > { %p1105_p5 = pnand %p1104_p4, %p1460_p0 }
 0x2f1   : > { %p1110_p12 = por %p1109_p11, %p1108_p10 }
 0x2f2   : > { %p1106_p6 = pneg %p1105_p5 }
 0x2f4   : > { %p1111_p1 = pnand %p1110_p12, %p1106_p6 }
 0x2f6   : > { %1114 = shalt.err (!%p1111_p1)
}
 0x2f7   : > { %958 = dma.vmem_to_hbm [thread:$0]  (%p1460_p0), %s754_s18, 16, %s1404_s23, %s741_s15  }
 0x2f8 PF: > { %s765_s24 = sand.u32 1, %s1145_s26   ;;  %p1461_p9 = scmp.ne.s32.totalorder %s1453_s14, 0 }
 0x2f9   : > { %s766_s20 = scalar_lea.sflag [#allocation6], %s765_s24 }
 0x2fa   : > { %p968_p13 = pnand %p840_p8, %p1461_p9 }
 0x2fc   : > { %p969_p2 = pneg %p968_p13 }
 0x2fe   : > { %1140 = dma.done.wait (%p969_p2), %s766_s20, 16  }
 0x2ff   : > { %1142 = vsyncadd (%p969_p2), %s766_s20, 4294967280  ;;  %p21_p3 = scmp.ge.s32.totalorder %s1235_s8, 4   ;;  %s1462_s26 = smov %s1149_s27 }
 0x300   : > { %s1463_s27 = smov %s1153_s28  ;;  %s1464_s28 = smov %s1247_s11 }
 0x301   : > { %s1465_s29 = smov %s1235_s8  ;;  %23 = sbr.rel (!%p21_p3) target bundleno = 8 (0x8), region = 135 }
 0x306   :  { %770 = vsyncpa [#allocation5], 1 }
 0x307   :  { %772 = vsyncpa [#allocation5 + $0x1], 1 }
 0x308   :  { %773 = vsyncpa [#allocation8], 1 }
 0x309   :  { %774 = vsyncpa [#allocation6], 1 }
 0x30a   :  { %776 = vsyncpa [#allocation6 + $0x1], 1 }

</bundles_post_ra>
